<compile_context>
chip_gen: v5e
topology: v5e:2x2
jax: 0.10.0
libtpu: 0.0.40
codegen_flags: <defaults>
</compile_context>

<pallas_src>
import functools
import math

import jax
import jax.numpy as jnp
from jax import lax
from jax.experimental import pallas as pl
from jax.experimental.pallas import tpu as pltpu


# ----------------------------------------------------------------------------
# VMEM budget / tiling helpers
# ----------------------------------------------------------------------------
def _round_up(x, m):
    return (x + m - 1) // m * m


def _round_ch(c):
    # Channel / K padding.  Real channel counts in this net are multiples of
    # 128 (except the 64-wide stem), and K/N are never split into 128-wide
    # tiles: full extents stay resident, so the v6e/v7x 256x256 MXU is fed
    # >=256-wide operands everywhere the data allows it.
    return _round_up(c, 128)


def _detect_vmem_budget():
    """Per-generation VMEM budget (~5/8 of physical: v5e/v6e 128 MiB, v7x 64 MiB)."""
    cap = 64 * 1024 * 1024
    try:
        cap = int(pltpu.get_tpu_info().vmem_capacity_bytes)
    except Exception:
        pass
    return int(min(cap * 5 // 8, 96 * 1024 * 1024))


_VMEM_BUDGET = _detect_vmem_budget()


def _slab_rows(M):
    """Canonical padded row count of an activation slab.  A function of M only
    so main-path and residual slabs of the same spatial size always line up."""
    if M <= 512:
        return _round_up(M, 16)
    if M <= 4096:
        return _round_up(M, 128)
    return _round_up(M, 512)


def _choose_tm(Mp, cap):
    """Largest row tile that divides Mp, fits the VMEM row budget `cap`, and
    keeps >=2 M tiles when possible (feeds both v7x TensorCores)."""
    cap = max(16, min(int(cap), 1024))
    if Mp <= cap:
        if Mp >= 64 and Mp % 32 == 0:
            return Mp // 2
        return Mp
    for tm in (1024, 512, 256, 128, 64, 32, 16):
        if tm <= cap and Mp % tm == 0:
            return tm
    return 16


def _tm_cap_matmul(Kp, Np):
    """Row budget for the full-K-resident matmul kernel (weight and outputs
    counted double-buffered, conservatively)."""
    fixed = 2 * Kp * Np * 2 + 2 * 8 * Np * 4
    per_row = 2 * Kp * 2 + 2 * Np * 2 + Np * 4 + 8
    return max(16, (_VMEM_BUDGET - fixed) // per_row)


def _tm_cap_conv3(Cp, Coutp):
    """Row budget for the shifted-window 3x3 kernel (two A tiles + tap slices)."""
    fixed = 2 * 9 * Cp * Coutp * 2 + 2 * 8 * Coutp * 4
    per_row = 2 * 2 * Cp * 2 + 2 * Coutp * 2 + Coutp * 4 + 4 * Cp * 2 + 8
    return max(16, (_VMEM_BUDGET - fixed) // per_row)


# ----------------------------------------------------------------------------
# Pallas kernels
# ----------------------------------------------------------------------------
def _emit_y_and_stats(acc, mask_ref, y_ref, stats_ref):
    """Write the bf16 conv-output tile plus masked per-channel sum and
    sum-of-squares (rows 0/1 of the 8-row stats slab; rows 2..7 are left
    untouched and never read on the host)."""
    y_ref[...] = acc.astype(y_ref.dtype)
    m = mask_ref[...]                              # (tm, 1) f32 validity mask
    am = acc * m
    stats_ref[0:1, :] = jnp.sum(am, axis=0, keepdims=True)
    stats_ref[1:2, :] = jnp.sum(am * acc, axis=0, keepdims=True)


def _mm_stats_kernel(a_ref, w_ref, mask_ref, y_ref, stats_ref):
    """One M tile of A @ W: full K and full N resident, A streams once."""
    acc = jnp.dot(a_ref[...], w_ref[...], preferred_element_type=jnp.float32)
    _emit_y_and_stats(acc, mask_ref, y_ref, stats_ref)


def _bn_act_kernel(y_ref, scale_ref, shift_ref, *rest, apply_relu,
                   add_residual):
    """Fused BatchNorm affine + optional residual add + optional ReLU.
    f32 math, bf16 in/out, output aliased in place of the Y input."""
    o_ref = rest[-1]
    out = y_ref[...].astype(jnp.float32) * scale_ref[...] + shift_ref[...]
    if add_residual:
        out = out + rest[0][...].astype(jnp.float32)
    if apply_relu:
        out = jnp.maximum(out, 0.0)
    o_ref[...] = out.astype(o_ref.dtype)


# ----------------------------------------------------------------------------
# Cached pallas_call builders (identical configs reuse one traced callable)
# ----------------------------------------------------------------------------
@functools.lru_cache(maxsize=None)
def _matmul_stats_call(Mp, Kp, Np, tm):
    nm = Mp // tm
    return pl.pallas_call(
        _mm_stats_kernel,
        out_shape=(jax.ShapeDtypeStruct((Mp, Np), jnp.bfloat16),
                   jax.ShapeDtypeStruct((nm * 8, Np), jnp.float32)),
        grid=(nm,),
        in_specs=[
            pl.BlockSpec((tm, Kp), lambda i: (i, 0)),     # A: streamed once
            pl.BlockSpec((Kp, Np), lambda i: (0, 0)),     # W: fully resident
            pl.BlockSpec((tm, 1), lambda i: (i, 0)),      # row-validity mask
        ],
        out_specs=[
            pl.BlockSpec((tm, Np), lambda i: (i, 0)),
            pl.BlockSpec((8, Np), lambda i: (i, 0)),
        ],
        compiler_params=pltpu.CompilerParams(
            dimension_semantics=("parallel",),
            vmem_limit_bytes=_VMEM_BUDGET),
    )


def _matmul_stats(a, w, mask, tm):
    return _matmul_stats_call(a.shape[0], a.shape[1], w.shape[1], tm)(a, w,
                                                                      mask)


@functools.lru_cache(maxsize=None)
def _conv3x3_call(Mpg, Cp, Coutp, Wp, tm):
    """Stride-1 3x3 conv on the flattened spatially padded activation.  Tap
    (di, dj) is the input shifted by di*Wp + dj rows, read from the current +
    next M tile (the halo 2*Wp + 2 <= tm), so no im2col slab exists in HBM."""
    nm = Mpg // tm
    offs = tuple(di * Wp + dj for di in range(3) for dj in range(3))

    def kernel(a0_ref, a1_ref, w_ref, mask_ref, y_ref, stats_ref):
        big = jnp.concatenate([a0_ref[...], a1_ref[...]], axis=0)  # (2tm, Cp)
        acc = jnp.zeros((tm, Coutp), jnp.float32)
        for t, off in enumerate(offs):                             # static
            acc = acc + jnp.dot(big[off:off + tm, :], w_ref[t],
                                preferred_element_type=jnp.float32)
        _emit_y_and_stats(acc, mask_ref, y_ref, stats_ref)

    return pl.pallas_call(
        kernel,
        out_shape=(jax.ShapeDtypeStruct((Mpg, Coutp), jnp.bfloat16),
                   jax.ShapeDtypeStruct((nm * 8, Coutp), jnp.float32)),
        grid=(nm,),
        in_specs=[
            pl.BlockSpec((tm, Cp), lambda i: (i, 0)),         # current tile
            pl.BlockSpec((tm, Cp), lambda i: (i + 1, 0)),     # halo tile
            pl.BlockSpec((9, Cp, Coutp), lambda i: (0, 0, 0)),  # taps resident
            pl.BlockSpec((tm, 1), lambda i: (i, 0)),
        ],
        out_specs=[
            pl.BlockSpec((tm, Coutp), lambda i: (i, 0)),
            pl.BlockSpec((8, Coutp), lambda i: (i, 0)),
        ],
        compiler_params=pltpu.CompilerParams(
            dimension_semantics=("parallel",),
            vmem_limit_bytes=_VMEM_BUDGET),
    )


def _conv3x3_s1_stats(a_flat, w_taps, mask, Wp, tm):
    Mpg = a_flat.shape[0] - tm                   # trailing tile = zero halo
    Cp = a_flat.shape[1]
    Coutp = w_taps.shape[2]
    return _conv3x3_call(Mpg, Cp, Coutp, Wp, tm)(a_flat, a_flat, w_taps, mask)


@functools.lru_cache(maxsize=None)
def _bn_act_call(Mp, Np, tm, relu, add_res):
    nm = Mp // tm
    kernel = functools.partial(_bn_act_kernel, apply_relu=relu,
                               add_residual=add_res)
    in_specs = [pl.BlockSpec((tm, Np), lambda i: (i, 0)),
                pl.BlockSpec((1, Np), lambda i: (0, 0)),
                pl.BlockSpec((1, Np), lambda i: (0, 0))]
    if add_res:
        in_specs.append(pl.BlockSpec((tm, Np), lambda i: (i, 0)))
    return pl.pallas_call(
        kernel,
        out_shape=jax.ShapeDtypeStruct((Mp, Np), jnp.bfloat16),
        grid=(nm,),
        in_specs=in_specs,
        out_specs=pl.BlockSpec((tm, Np), lambda i: (i, 0)),
        input_output_aliases={0: 0},              # write in place of Y
        compiler_params=pltpu.CompilerParams(
            dimension_semantics=("parallel",),
            vmem_limit_bytes=_VMEM_BUDGET),
    )


def _bn_act(y, scale, shift, res, tm, relu):
    Mp, Np = y.shape
    call = _bn_act_call(Mp, Np, tm, bool(relu), res is not None)
    args = (y, scale, shift) if res is None else (y, scale, shift, res)
    return call(*args)


# ----------------------------------------------------------------------------
# Activation-slab plumbing.  Inter-layer format: channel-padded bf16 (Mp, Np).
# Padded rows may carry garbage after an epilogue and are masked out of BN
# statistics; padded channels stay exactly zero (zero gamma/beta/weights).
# ----------------------------------------------------------------------------
def _to_slab(x_nhwc, c_real):
    N, H, W, Cp = x_nhwc.shape
    M = N * H * W
    Mp = _slab_rows(M)
    flat = x_nhwc.reshape(M, Cp)
    if Mp > M:
        flat = jnp.pad(flat, ((0, Mp - M), (0, 0)))
    return {"data": flat, "N": N, "H": H, "W": W, "C": c_real}


def _slab_to_nhwc(slab):
    M = slab["N"] * slab["H"] * slab["W"]
    return slab["data"][:M].reshape(slab["N"], slab["H"], slab["W"], -1)


def _row_mask(Mp, M):
    return (jnp.arange(Mp, dtype=jnp.int32) < M).astype(
        jnp.float32).reshape(Mp, 1)


def _padgrid_mask(Mpg, N, H, W, Hp, Wp):
    r = jnp.arange(Mpg, dtype=jnp.int32)
    hw = r % (Hp * Wp)
    valid = (r < N * Hp * Wp) & (hw // Wp < H) & (hw % Wp < W)
    return valid.astype(jnp.float32).reshape(Mpg, 1)


def _bn_fold(stats, n_valid, gamma, beta, eps=1e-5):
    """Training-mode BatchNorm: fold batch statistics into scale / shift."""
    Np = stats.shape[1]
    st = stats.reshape(-1, 8, Np)
    s = jnp.sum(st[:, 0, :], axis=0)
    ss = jnp.sum(st[:, 1, :], axis=0)
    mean = s / n_valid
    var = jnp.maximum(ss / n_valid - mean * mean, 0.0)
    inv_std = lax.rsqrt(var + eps)
    scale = gamma * inv_std
    shift = beta - mean * scale
    return scale.reshape(1, Np), shift.reshape(1, Np)


def im2col(x, kh, kw, stride, pad):
    """x: NHWC -> patches (N*Ho*Wo, kh*kw*C), (i, j, c) ordering.  Used only by
    the stem 7x7 and the three strided 3x3 convs."""
    N, H, W, C = x.shape
    Ho = (H + 2 * pad - kh) // stride + 1
    Wo = (W + 2 * pad - kw) // stride + 1
    xp = jnp.pad(x, ((0, 0), (pad, pad), (pad, pad), (0, 0)))
    cols = []
    for i in range(kh):
        for j in range(kw):
            cols.append(xp[:, i:i + stride * Ho:stride,
                           j:j + stride * Wo:stride, :])
    patches = jnp.concatenate(cols, axis=-1)
    return patches.reshape(N * Ho * Wo, kh * kw * C), (N, Ho, Wo)


# ----------------------------------------------------------------------------
# Conv + BN + ReLU layers
# ----------------------------------------------------------------------------
def conv1x1_bn_act(slab, conv, bn, *, stride=1, relu=True, residual=None):
    """1x1 conv straight off the compact slab (no im2col, no slice/re-pad)."""
    N, H, W = slab["N"], slab["H"], slab["W"]
    a = slab["data"]
    if stride != 1:
        x = _slab_to_nhwc(slab)[:, ::stride, ::stride, :]
        N, H, W = x.shape[0], x.shape[1], x.shape[2]
        M = N * H * W
        Mp = _slab_rows(M)
        a = jnp.pad(x.reshape(M, x.shape[3]), ((0, Mp - M), (0, 0)))
    M = N * H * W
    Mp, Cp = a.shape
    w = conv["w"]                                    # (Cp, Coutp) bf16
    tm = _choose_tm(Mp, _tm_cap_matmul(Cp, w.shape[1]))
    y, stats = _matmul_stats(a, w, _row_mask(Mp, M), tm)
    scale, shift = _bn_fold(stats, M, bn["gamma"], bn["beta"])
    res = residual["data"] if residual is not None else None
    out = _bn_act(y, scale, shift, res, tm, relu)
    return {"data": out, "N": N, "H": H, "W": W, "C": conv["cout"]}


def conv3x3_bn_act(slab, conv, bn, *, stride=1, relu=True):
    """3x3 conv: stride 1 uses in-kernel shifted-window tap folding; the rare
    strided case falls back to im2col."""
    N, H, W = slab["N"], slab["H"], slab["W"]
    if stride == 1:
        Hp, Wp = H + 2, W + 2
        rows = N * Hp * Wp
        Mpg = _slab_rows(rows)
        Cp = slab["data"].shape[1]
        Coutp = conv["w"].shape[2]
        tm = _choose_tm(Mpg, _tm_cap_conv3(Cp, Coutp))
        if 2 * Wp + 2 <= tm:                          # halo fits in one tile
            xpad = jnp.pad(_slab_to_nhwc(slab),
                           ((0, 0), (1, 1), (1, 1), (0, 0)))
            a = jnp.pad(xpad.reshape(rows, Cp),
                        ((0, Mpg - rows + tm), (0, 0)))
            mask = _padgrid_mask(Mpg, N, H, W, Hp, Wp)
            y, stats = _conv3x3_s1_stats(a, conv["w"], mask, Wp, tm)
            scale, shift = _bn_fold(stats, N * H * W, bn["gamma"], bn["beta"])
            outp = _bn_act(y, scale, shift, None, tm, relu)
            out = outp[:rows].reshape(N, Hp, Wp, Coutp)[:, :H, :W, :]
            return _to_slab(out, conv["cout"])
    # im2col fallback (3 strided 3x3 convs in the whole network).
    # TODO(synk): fold taps for stride 2 via a 2x2 phase decomposition.
    a2d, (N, Ho, Wo) = im2col(_slab_to_nhwc(slab), 3, 3, stride, 1)
    M = N * Ho * Wo
    Mp = _slab_rows(M)
    a = jnp.pad(a2d, ((0, Mp - M), (0, 0)))
    w = conv["w"].reshape(a.shape[1], -1)            # (9*Cp, Coutp)
    tm = _choose_tm(Mp, _tm_cap_matmul(w.shape[0], w.shape[1]))
    y, stats = _matmul_stats(a, w, _row_mask(Mp, M), tm)
    scale, shift = _bn_fold(stats, M, bn["gamma"], bn["beta"])
    out = _bn_act(y, scale, shift, None, tm, relu)
    return {"data": out, "N": N, "H": Ho, "W": Wo, "C": conv["cout"]}


def stem_conv_bn_relu(x_nhwc, conv, bn):
    """7x7 / stride-2 stem conv via dense im2col (cin=3 so the patch slab is
    small), fused with training-mode BN + ReLU."""
    a2d, (N, Ho, Wo) = im2col(x_nhwc.astype(jnp.bfloat16), 7, 7, 2, 3)
    M = N * Ho * Wo
    K = conv["K"]
    Kp, Np = conv["w"].shape
    Mp = _slab_rows(M)
    a = jnp.pad(a2d, ((0, Mp - M), (0, Kp - K)))
    tm = _choose_tm(Mp, _tm_cap_matmul(Kp, Np))
    y, stats = _matmul_stats(a, conv["w"], _row_mask(Mp, M), tm)
    scale, shift = _bn_fold(stats, M, bn["gamma"], bn["beta"])
    out = _bn_act(y, scale, shift, None, tm, True)
    return {"data": out, "N": N, "H": Ho, "W": Wo, "C": conv["cout"]}


def maxpool2d(x, k=3, stride=2, pad=1):
    """PyTorch-style MaxPool2d via a shifted-slice max tree (no patch blowup)."""
    N, H, W, C = x.shape
    Ho = (H + 2 * pad - k) // stride + 1
    Wo = (W + 2 * pad - k) // stride + 1
    neg = jnp.finfo(x.dtype).min
    xp = jnp.pad(x, ((0, 0), (pad, pad), (pad, pad), (0, 0)),
                 constant_values=neg)
    out = None
    for i in range(k):
        for j in range(k):
            tap = xp[:, i:i + stride * Ho:stride, j:j + stride * Wo:stride, :]
            out = tap if out is None else jnp.maximum(out, tap)
    return out


# ----------------------------------------------------------------------------
# Parameter construction (mirrors the torch __init__ init scheme); weights are
# pre-transposed, channel-padded and cast to bf16 once.
# ----------------------------------------------------------------------------
def _prep_conv1x1(key, cout, cin):
    std = math.sqrt(2.0 / cout)                      # n = 1*1*cout
    w = jax.random.normal(key, (cout, cin), jnp.float32) * std
    Cp, Coutp = _round_ch(cin), _round_ch(cout)
    w_mat = jnp.pad(w.T, ((0, Cp - cin), (0, Coutp - cout)))
    return {"w": w_mat.astype(jnp.bfloat16), "cin": cin, "cout": cout}


def _prep_conv3x3(key, cout, cin):
    std = math.sqrt(2.0 / (9 * cout))                # n = 3*3*cout
    w = jax.random.normal(key, (cout, cin, 3, 3), jnp.float32) * std
    Cp, Coutp = _round_ch(cin), _round_ch(cout)
    # (cout, cin, 3, 3) -> (tap = di*3 + dj, cin, cout), channel-padded per tap
    wt = jnp.transpose(w, (2, 3, 1, 0)).reshape(9, cin, cout)
    wt = jnp.pad(wt, ((0, 0), (0, Cp - cin), (0, Coutp - cout)))
    return {"w": wt.astype(jnp.bfloat16), "cin": cin, "cout": cout}


def _prep_conv_dense(key, cout, cin, kh, kw):
    std = math.sqrt(2.0 / (kh * kw * cout))
    w = jax.random.normal(key, (cout, cin, kh, kw), jnp.float32) * std
    K = kh * kw * cin
    Kp, Coutp = _round_up(K, 128), _round_ch(cout)
    w_mat = jnp.transpose(w, (2, 3, 1, 0)).reshape(K, cout)
    w_mat = jnp.pad(w_mat, ((0, Kp - K), (0, Coutp - cout)))
    return {"w": w_mat.astype(jnp.bfloat16), "K": K, "cin": cin, "cout": cout}


def _prep_bn(c):
    Np = _round_ch(c)
    gamma = jnp.pad(jnp.ones((c,), jnp.float32), (0, Np - c))
    beta = jnp.zeros((Np,), jnp.float32)
    return {"gamma": gamma, "beta": beta}


def make_resnet_params(key, in_channels=3, layers=(3, 4, 6, 3, 2),
                       inplanes=64):
    keys = iter(jax.random.split(key, 256))
    params = {
        "conv1": _prep_conv_dense(next(keys), 64, in_channels, 7, 7),
        "bn1": _prep_bn(64),
        "layers": [],
    }
    planes_list = [64, 128, 256, 512, 256]
    strides = [1, 2, 2, 2, 1]
    cur = inplanes
    for planes, nblocks, layer_stride in zip(planes_list, layers, strides):
        blocks = []
        for bi in range(nblocks):
            s = layer_stride if bi == 0 else 1
            blk = {
                "stride": s,
                "conv1": _prep_conv1x1(next(keys), planes, cur),
                "bn1": _prep_bn(planes),
                "conv2": _prep_conv3x3(next(keys), planes, planes),
                "bn2": _prep_bn(planes),
                "conv3": _prep_conv1x1(next(keys), planes * 4, planes),
                "bn3": _prep_bn(planes * 4),
            }
            if bi == 0 and (layer_stride != 1 or cur != planes * 4):
                blk["ds_conv"] = _prep_conv1x1(next(keys), planes * 4, cur)
                blk["ds_bn"] = _prep_bn(planes * 4)
            cur = planes * 4
            blocks.append(blk)
        params["layers"].append(blocks)
    return params


# ----------------------------------------------------------------------------
# Forward pass
# ----------------------------------------------------------------------------
def bottleneck_forward(slab, blk):
    s = blk["stride"]
    if "ds_conv" in blk:
        residual = conv1x1_bn_act(slab, blk["ds_conv"], blk["ds_bn"],
                                  stride=s, relu=False)
    else:
        residual = slab
    out = conv1x1_bn_act(slab, blk["conv1"], blk["bn1"], relu=True)
    out = conv3x3_bn_act(out, blk["conv2"], blk["bn2"], stride=s, relu=True)
    out = conv1x1_bn_act(out, blk["conv3"], blk["bn3"], relu=True,
                         residual=residual)
    return out


def resnet_forward(x_nchw, params):
    x = jnp.transpose(x_nchw, (0, 2, 3, 1))                 # NCHW -> NHWC
    slab = stem_conv_bn_relu(x, params["conv1"], params["bn1"])
    slab = _to_slab(maxpool2d(_slab_to_nhwc(slab)), slab["C"])
    for layer in params["layers"]:
        for blk in layer:
            slab = bottleneck_forward(slab, blk)
    out = _slab_to_nhwc(slab)[..., :slab["C"]]              # drop channel pad
    return jnp.transpose(out, (0, 3, 1, 2)).astype(jnp.float32)  # NHWC->NCHW


# ----------------------------------------------------------------------------
if __name__ == "__main__":
    root = jax.random.PRNGKey(0)
    k_param, k_input = jax.random.split(root)

    params = make_resnet_params(k_param, in_channels=3)
    x = jax.random.normal(k_input, (2, 3, 32, 32), jnp.float32)

    y = resnet_forward(x, params)
    y = jax.block_until_ready(y)

    assert y.shape == (2, 1024, 1, 1), y.shape
    assert bool(jnp.all(jnp.isfinite(y)))
    print("KERNEL_OK")
</pallas_src>

<mosaic_0001>
module attributes {stable_mosaic.version = 11 : i64} {
  func.func @_mm_stats_kernel(%arg0: i32, %arg1: memref<256x256xbf16, #tpu.memory_space<vmem>>, %arg2: memref<256x128xbf16, #tpu.memory_space<vmem>>, %arg3: memref<256x1xf32, #tpu.memory_space<vmem>>, %arg4: memref<256x128xbf16, #tpu.memory_space<vmem>>, %arg5: memref<8x128xf32, #tpu.memory_space<vmem>>) attributes {dimension_semantics = [#tpu.dimension_semantics<parallel>], iteration_bounds = array<i64: 2>, scalar_prefetch = 0 : i64, scratch_operands = 0 : i64, tpu.core_type = #tpu.core_type<tc>, window_params = [{transform_indices = @transform_0, window_bounds = array<i64: 256, 256>}, {pipeline_mode = #tpu.pipeline_mode<synchronous>, transform_indices = @transform_1, window_bounds = array<i64: 256, 128>}, {transform_indices = @transform_2, window_bounds = array<i64: 256, 1>}, {transform_indices = @transform_3, window_bounds = array<i64: 256, 128>}, {transform_indices = @transform_4, window_bounds = array<i64: 8, 128>}]} {
    %c0 = arith.constant 0 : index
    %c0_0 = arith.constant 0 : index
    %0 = vector.load %arg1[%c0, %c0_0] : memref<256x256xbf16, #tpu.memory_space<vmem>>, vector<256x256xbf16>
    %c0_1 = arith.constant 0 : index
    %c0_2 = arith.constant 0 : index
    %1 = vector.load %arg2[%c0_1, %c0_2] : memref<256x128xbf16, #tpu.memory_space<vmem>>, vector<256x128xbf16>
    %cst = arith.constant dense<0.000000e+00> : vector<256x128xf32>
    %2 = tpu.matmul %0, %1, %cst {dimension_numbers = #tpu.dot_dimension_numbers<[1], [0], [0], [1], [0, 0, 1, 1], [], []>} : vector<256x256xbf16>, vector<256x128xbf16>, vector<256x128xf32> -> vector<256x128xf32>
    %3 = arith.truncf %2 : vector<256x128xf32> to vector<256x128xbf16>
    %c0_3 = arith.constant 0 : index
    %c0_4 = arith.constant 0 : index
    %4 = vector.load %arg4[%c0_3, %c0_4] : memref<256x128xbf16, #tpu.memory_space<vmem>>, vector<256x128xbf16>
    tpu.vector_store %arg4[%c0_3, %c0_4], %3 {strides = array<i32>} : memref<256x128xbf16, #tpu.memory_space<vmem>>, vector<256x128xbf16>,
    %c0_5 = arith.constant 0 : index
    %c0_6 = arith.constant 0 : index
    %5 = vector.load %arg3[%c0_5, %c0_6] : memref<256x1xf32, #tpu.memory_space<vmem>>, vector<256x1xf32>
    %6 = vector.broadcast %5 : vector<256x1xf32> to vector<256x128xf32>
    %7 = arith.mulf %2, %6 : vector<256x128xf32>
    %cst_7 = arith.constant dense<0.000000e+00> : vector<128xf32>
    %8 = vector.multi_reduction <add>, %7, %cst_7 [0] : vector<256x128xf32> to vector<128xf32>
    %9 = vector.shape_cast %8 : vector<128xf32> to vector<1x128xf32>
    %c0_8 = arith.constant 0 : index
    %c0_9 = arith.constant 0 : index
    %10 = vector.load %arg5[%c0_8, %c0_9] : memref<8x128xf32, #tpu.memory_space<vmem>>, vector<1x128xf32>
    tpu.vector_store %arg5[%c0_8, %c0_9], %9 {strides = array<i32>} : memref<8x128xf32, #tpu.memory_space<vmem>>, vector<1x128xf32>,
    %11 = arith.mulf %7, %2 : vector<256x128xf32>
    %cst_10 = arith.constant dense<0.000000e+00> : vector<128xf32>
    %12 = vector.multi_reduction <add>, %11, %cst_10 [0] : vector<256x128xf32> to vector<128xf32>
    %13 = vector.shape_cast %12 : vector<128xf32> to vector<1x128xf32>
    %c1 = arith.constant 1 : index
    %c0_11 = arith.constant 0 : index
    %14 = vector.load %arg5[%c1, %c0_11] : memref<8x128xf32, #tpu.memory_space<vmem>>, vector<1x128xf32>
    tpu.vector_store %arg5[%c1, %c0_11], %13 {strides = array<i32>} : memref<8x128xf32, #tpu.memory_space<vmem>>, vector<1x128xf32>,
    return
  }
  func.func @transform_0(%arg0: i32) -> (i32, i32) {
    %c0_i32 = arith.constant 0 : i32
    %c0_i32_0 = arith.constant 0 : i32
    return %arg0, %c0_i32 : i32, i32
  }
  func.func @transform_1(%arg0: i32) -> (i32, i32) {
    %c0_i32 = arith.constant 0 : i32
    %c0_i32_0 = arith.constant 0 : i32
    %c0_i32_1 = arith.constant 0 : i32
    return %c0_i32, %c0_i32_0 : i32, i32
  }
  func.func @transform_2(%arg0: i32) -> (i32, i32) {
    %c0_i32 = arith.constant 0 : i32
    %c0_i32_0 = arith.constant 0 : i32
    return %arg0, %c0_i32 : i32, i32
  }
  func.func @transform_3(%arg0: i32) -> (i32, i32) {
    %c0_i32 = arith.constant 0 : i32
    %c0_i32_0 = arith.constant 0 : i32
    return %arg0, %c0_i32 : i32, i32
  }
  func.func @transform_4(%arg0: i32) -> (i32, i32) {
    %c0_i32 = arith.constant 0 : i32
    %c0_i32_0 = arith.constant 0 : i32
    return %arg0, %c0_i32 : i32, i32
  }
}

</mosaic_0001>

<bundles_post_ra>
// kernel: tpu_custom_call.1
= control target key start
LH: loop header
LB: loop body
LE: loop exit
PB: predicated region body
PF: predicated region fallthrough
CT: control target
= control target key end

     0   :  { %10 = vsyncpa [#allocation3], 0  ;;  %s2262_s0 = inlined_call_operand.vmem [shape: bf16[512,256], index: 0, kind: input, shape index: {}]   ;;  %s2263_s1 = inlined_call_operand.hbm [shape: bf16[256,128], index: 1, kind: input, shape index: {}]   ;;  %s2264_s2 = inlined_call_operand.vmem [shape: f32[512,1], index: 2, kind: input, shape index: {}]   ;;  %s2265_s3 = inlined_call_operand.hbm [shape: bf16[512,128], index: 3, kind: output, shape index: {0}]   ;;  %s2266_s4 = inlined_call_operand.hbm [shape: f32[16,128], index: 4, kind: output, shape index: {1}]  }
   0x1   :  { %11 = vsyncpa [#allocation4], 0 }
   0x2   :  { %13 = vsyncpa [#allocation4 + $0x1], 0 }
   0x3   :  { %14 = vsyncpa [#allocation7], 0 }
   0x4   :  { %16 = vsyncpa [#allocation7 + $0x1], 0  ;;  %s1897_s15 = smov 0   ;;  %s1899_s16 = smov 0  }
   0x5   :  { %s1901_s17 = smov 0   ;;  %s1903_s18 = smov 0  }
   0x6 LB: > { %s1918_s19 = sadd.s32 4294967295, %s1864_s18   ;;  %s1300_s20 = sadd.s32 4294967294, %s1864_s18   ;;  %s1864_s18 = sphi %s1903_s18, %s2272_s18   ;;  %s1860_s17 = sphi %s1901_s17, %s2271_s17   ;;  %s1856_s16 = sphi %s1899_s16, %s2270_s16   ;;  %s1852_s15 = sphi %s1897_s15, %s2269_s15  }
   0x7   : > { %s1922_s21 = sadd.s32 1, %s1864_s18   ;;  %s102_s22 = sadd.s32 1, %s1860_s17 }
   0x8   : > { %s99_s23 = ssub.s32 %s1864_s18, %s1922_s21  ;;  %p112_p0 = scmp.ne.s32.totalorder %s1860_s17, %s1856_s16 }
   0x9   : > { %p100_p1 = scmp.eq.s32.totalorder %s99_s23, 0  ;;  %p113_p2 = scmp.eq.s32.totalorder %s1918_s19, 1 }
   0xa   : > { %p118_p3 = scmp.ne.s32.totalorder %s1856_s16, %s1852_s15  ;;  %p119_p4 = scmp.eq.s32.totalorder %s1300_s20, 1 }
   0xb   : > { %s1933_s24 = scalar_select %p100_p1, %s1860_s17, %s102_s22  }
   0xc   : > { %p1935_p5 = por %p113_p2, %p112_p0  ;;  %p1939_p6 = por %p119_p4, %p118_p3 }
   0xd   : > { %p1301_p7 = scmp.ge.s32.totalorder %s1864_s18, 1  ;;  %p152_p8 = scmp.lt.s32.totalorder %s1864_s18, 3 }
   0xe   : > { %p1692_p9 = scmp.eq.s32.totalorder %s1918_s19, 0  ;;  %s163_s29 = sshll.u32 %s2263_s1, 4  ;;  %s164_s29 = int_to_ptr.hbm [resolvable:$true] %s163_s29 }
   0xf   : > { %p153_p10 = pnand %p1301_p7, %p152_p8  ;;  %s1866_s30 = smov [#allocation2]  }
  0x10   : > { %s165_s5 = sshll.u32 %s1866_s30, 4  ;;  %s1867_s6 = smov 64   ;;  %s166_s5 = int_to_ptr.vmem [resolvable:$true] %s165_s5 }
  0x11   : > { %p1681_p11 = pneg %p153_p10  ;;  %s1868_s7 = smov 4  }
  0x12   : > { %200 = sbr.rel (%p153_p10) target bundleno = 358 (0x166), region = 32 }
  0x13   : > { %p1682_p12 = pnand %p1692_p9, %p1681_p11 }
  0x15   : > { %1684 = dma.hbm_to_vmem [thread:$0]  (!%p1682_p12), %s164_s29, 2048, %s166_s5, [#allocation3], %s1867_s6, %s1867_s6, %s1868_s7  }
  0x17   : > { %1839 = dma.done.wait (%p1692_p9), [#allocation3], 2048  }
  0x18   : > { %1841 = vsyncadd (%p1692_p9), [#allocation3], 4294965248  ;;  %s1308_s8 = sshll.u32 %s1918_s19, 5  ;;  %v1552_v0 = vld [vmem:[#allocation2 + $0x38] sm:$0xff]  ;;  %v1551_v2 = vld [vmem:[#allocation2 + $0x30] sm:$0xff]  ;;  %v1869_v4 = vmov 0  }
  0x19   : > { %p239_p13 = scmp.lt.s32.totalorder %s1308_s8, 63  ;;  %v1560_v1 = vld [vmem:[#allocation2 + $0x78] sm:$0xff]  ;;  %572 = vmatpush.bf16.msra.mxu0 %v1552_v0  ;;  %1657 = vmatpush.bf16.msra.mxu2 %v1552_v0  ;;  %v1559_v3 = vld [vmem:[#allocation2 + $0x70] sm:$0xff]  ;;  %v1550_v5 = vld [vmem:[#allocation2 + $0x28] sm:$0xff]  ;;  %s2070_s22 = sand.u32 1, %s1856_s16  }
  0x1a   : > { %661 = vmatpush.bf16.msra.mxu1 %v1560_v1  ;;  %1665 = vmatpush.bf16.msra.mxu3 %v1560_v1  ;;  %v1558_v6 = vld [vmem:[#allocation2 + $0x68] sm:$0xff]  ;;  %v1549_v9 = vld [vmem:[#allocation2 + $0x20] sm:$0xff]  ;;  %v1548_v11 = vld [vmem:[#allocation2 + $0x18] sm:$0xff]  ;;  %s1306_s23 = sshll.u32 %s2070_s22, 7  ;;  %s1561_s28 = sshll.u32 %s1918_s19, 7 }
  0x1b   : > { %s2274_s8 = smov (!%p239_p13, %s1308_s8), 63  ;;  %1734 = vset.pattern.permute.xlu1 %v1869_v4  ;;  %1733 = vset.pattern.permute.xlu0 %v1869_v4  ;;  %v1557_v10 = vld [vmem:[#allocation2 + $0x60] sm:$0xff]  ;;  %v1556_v14 = vld [vmem:[#allocation2 + $0x58] sm:$0xff]  ;;  %v1547_v15 = vld [vmem:[#allocation2 + $0x10] sm:$0xff]  ;;  %s2073_s27 = scalar_lea.vmem [#allocation5], %s1306_s23 }
  0x1c   : > { %s1512_s9 = sshll.u32 %s2274_s8, 3  ;;  %1735 = vset.pattern.permute.xlu2 %v1869_v4  ;;  %v1555_v17 = vld [vmem:[#allocation2 + $0x50] sm:$0xff]  ;;  %v1546_v18 = vld [vmem:[#allocation2 + $0x8] sm:$0xff]  ;;  %v1545_v22 = vld [vmem:[#allocation2] sm:$0xff]  ;;  %s1163_s5 = scalar_lea.hbm %s2265_s3, %s1561_s28 }
  0x1d   : > { %s1964_s12 = scalar_lea.vmem %s2264_s2, %s1512_s9  ;;  %573 = vmatpush.bf16.msra.mxu0 %v1551_v2  ;;  %1658 = vmatpush.bf16.msra.mxu2 %v1551_v2  ;;  %s1976_s20 = scalar_lea.vmem %s2262_s0, %s1512_s9  ;;  %v1554_v21 = vld [vmem:[#allocation2 + $0x48] sm:$0xff]  ;;  %v1553_v23 = vld [vmem:[#allocation2 + $0x40] sm:$0xff] }
  0x1e   : > { %662 = vmatpush.bf16.msra.mxu1 %v1559_v3  ;;  %1666 = vmatpush.bf16.msra.mxu3 %v1559_v3  ;;  %v816_v7 = vld [vmem:[%s1964_s12 + $0x10] sm:$0xff]  ;;  %v814_v8 = vld [vmem:[%s1964_s12] sm:$0xff]  ;;  %v817_v12 = vld [vmem:[%s1964_s12 + $0x18] sm:$0xff]  ;;  %s1164_s6 = sshll.u32 %s2073_s27, 4  ;;  %s1166_s7 = sshll.u32 %s1163_s5, 4  ;;  %s2185_s6 = int_to_ptr.vmem [resolvable:$true] %s1164_s6  ;;  %s1167_s7 = int_to_ptr.hbm [resolvable:$true] %s1166_s7 }
  0x1f   : > { %858 = vperm.xlu1 %1734, %v816_v7   ;;  %848 = vperm.xlu0 %1733, %v814_v8   ;;  %v815_v13 = vld [vmem:[%s1964_s12 + $0x8] sm:$0xff]  ;;  %v818_v16 = vld [vmem:[%s1964_s12 + $0x20] sm:$0xff]  ;;  %v821_v19 = vld [vmem:[%s1964_s12 + $0x38] sm:$0xff]  ;;  %s1147_s8 = scalar_lea.sflag [#allocation4], %s2070_s22  ;;  %s1780_s9 = sshra.s32 %s1167_s7, 4  ;;  %s1781_s9 = int_to_ptr.hbm [resolvable:$true] %s1780_s9 }
  0x20   : > { %868 = vperm.xlu2 %1735, %v818_v16   ;;  %v820_v20 = vld [vmem:[%s1964_s12 + $0x30] sm:$0xff]  ;;  %v1315_v24 = vld [vmem:[%s1976_s20] sm:$0xf]  ;;  %v1514_v25 = vld [vmem:[%s1976_s20 + $0x4] sm:$0xf0]  ;;  %s1782_s10 = scalar_lea.hbm %s1781_s9, 128  ;;  %p1787_p3 = scmp.lt.s32.totalorder %s1781_s9, %s2265_s3 }
  0x21   : > { %574 = vmatpush.bf16.msra.mxu0 %v1550_v5  ;;  %1659 = vmatpush.bf16.msra.mxu2 %v1550_v5  ;;  %v1379_v26 = vld [vmem:[%s1976_s20 + $0x80] sm:$0xf]  ;;  %v1530_v27 = vld [vmem:[%s1976_s20 + $0x84] sm:$0xf0]  ;;  %v1513_v28 = vld [vmem:[%s1976_s20 + $0x4] sm:$0xf]  ;;  %v1316_v32 = vor.u32 %v1514_v25, %v1315_v24  ;;  %p1783_p0 = scmp.ne.s32.totalorder %s1781_s9, %s1782_s10 }
  0x22   : > { %663 = vmatpush.bf16.msra.mxu1 %v1558_v6  ;;  %1667 = vmatpush.bf16.msra.mxu3 %v1558_v6  ;;  %v1317_v29 = vld [vmem:[%s1976_s20 + $0x8] sm:$0xf0]  ;;  %v1529_v30 = vld [vmem:[%s1976_s20 + $0x84] sm:$0xf]  ;;  %v1380_v33 = vor.u32 %v1530_v27, %v1379_v26  ;;  %v824_v36 = vld [vmem:[%s1964_s12 + $0x50] sm:$0xff]  ;;  %s1786_s13 = scalar_lea.hbm %s2265_s3, 256 }
  0x23   : > { %v1381_v31 = vld [vmem:[%s1976_s20 + $0x88] sm:$0xf0]  ;;  %v1320_v34 = vor.u32 %v1513_v28, %v1317_v29  ;;  %v826_v40 = vld [vmem:[%s1964_s12 + $0x60] sm:$0xff]  ;;  %v1323_v41 = vld [vmem:[%s1976_s20 + $0x10] sm:$0xf]  ;;  %p1784_p1 = pnand %p1783_p0, %p1935_p5  ;;  %p1788_p4 = scmp.lt.s32.totalorder %s1786_s13, %s1782_s10 }
  0x24   : > { %v1384_v35 = vor.u32 %v1529_v30, %v1381_v31  ;;  %v823_v37 = vld [vmem:[%s1964_s12 + $0x48] sm:$0xff]  ;;  %v1516_v42 = vld [vmem:[%s1976_s20 + $0x14] sm:$0xf0]  ;;  %v822_v43 = vld [vmem:[%s1964_s12 + $0x40] sm:$0xff] }
  0x25   : > { %575 = vmatpush.bf16.msra.mxu0 %v1549_v9  ;;  %1660 = vmatpush.bf16.msra.mxu2 %v1549_v9  ;;  %v819_v38 = vld [vmem:[%s1964_s12 + $0x28] sm:$0xff]  ;;  %v1387_v44 = vld [vmem:[%s1976_s20 + $0x90] sm:$0xf]  ;;  %v1532_v45 = vld [vmem:[%s1976_s20 + $0x94] sm:$0xf0]  ;;  %v1324_v50 = vor.u32 %v1516_v42, %v1323_v41  ;;  %p1785_p2 = pneg %p1784_p1  ;;  %p1789_p7 = por %p1788_p4, %p1787_p3 }
  0x26   : > { %664 = vmatpush.bf16.msra.mxu1 %v1557_v10  ;;  %1668 = vmatpush.bf16.msra.mxu3 %v1557_v10  ;;  %v827_v39 = vld [vmem:[%s1964_s12 + $0x68] sm:$0xff]  ;;  %v1515_v46 = vld [vmem:[%s1976_s20 + $0x14] sm:$0xf]  ;;  %v1325_v47 = vld [vmem:[%s1976_s20 + $0x18] sm:$0xf0]  ;;  %v1388_v51 = vor.u32 %v1532_v45, %v1387_v44 }
  0x27   : > { %863 = vperm.xlu1 %1734, %v817_v12   ;;  %853 = vperm.xlu0 %1733, %v815_v13   ;;  %v1531_v48 = vld [vmem:[%s1976_s20 + $0x94] sm:$0xf]  ;;  %v1389_v49 = vld [vmem:[%s1976_s20 + $0x98] sm:$0xf0]  ;;  %v1328_v52 = vor.u32 %v1515_v46, %v1325_v47  ;;  %v830_v54 = vld [vmem:[%s1964_s12 + $0x80] sm:$0xff]  ;;  %p1790_p8 = pnand %p1789_p7, %p1785_p2 }
  0x28   : > { %873 = vperm.xlu2 %1735, %v819_v38   ;;  %v1392_v53 = vor.u32 %v1531_v48, %v1389_v49  ;;  %v829_v55 = vld [vmem:[%s1964_s12 + $0x78] sm:$0xff]  ;;  %v832_v57 = vld [vmem:[%s1964_s12 + $0x90] sm:$0xff]  ;;  %v1331_v59 = vld [vmem:[%s1976_s20 + $0x20] sm:$0xf] }
  0x29   : > { %576 = vmatpush.bf16.msra.mxu0 %v1548_v11  ;;  %1661 = vmatpush.bf16.msra.mxu2 %v1548_v11  ;;  %v825_v56 = vld [vmem:[%s1964_s12 + $0x58] sm:$0xff]  ;;  %v1518_v60 = vld [vmem:[%s1976_s20 + $0x24] sm:$0xf0]  ;;  %v828_v61 = vld [vmem:[%s1964_s12 + $0x70] sm:$0xff] }
  0x2a   : > { %665 = vmatpush.bf16.msra.mxu1 %v1556_v14  ;;  %1669 = vmatpush.bf16.msra.mxu3 %v1556_v14  ;;  %v833_v58 = vld [vmem:[%s1964_s12 + $0x98] sm:$0xff]  ;;  %v1395_v62 = vld [vmem:[%s1976_s20 + $0xa0] sm:$0xf]  ;;  %v1534_v63 = vld [vmem:[%s1976_s20 + $0xa4] sm:$0xf0]  ;;  %v1332_v4 = vor.u32 %v1518_v60, %v1331_v59 }
  0x2b   : > { %v1517_v0 = vld [vmem:[%s1976_s20 + $0x24] sm:$0xf]  ;;  %v1333_v1 = vld [vmem:[%s1976_s20 + $0x28] sm:$0xf0]  ;;  %v1396_v5 = vor.u32 %v1534_v63, %v1395_v62  ;;  %v836_v9 = vld [vmem:[%s1964_s12 + $0xb0] sm:$0xff] }
  0x2c   : > { %v1533_v2 = vld [vmem:[%s1976_s20 + $0xa4] sm:$0xf]  ;;  %v1397_v3 = vld [vmem:[%s1976_s20 + $0xa8] sm:$0xf0]  ;;  %v1336_v6 = vor.u32 %v1517_v0, %v1333_v1  ;;  %v1339_v13 = vld [vmem:[%s1976_s20 + $0x30] sm:$0xf] }
  0x2d   : > { %577 = vmatpush.bf16.msra.mxu0 %v1547_v15  ;;  %1662 = vmatpush.bf16.msra.mxu2 %v1547_v15  ;;  %v1400_v7 = vor.u32 %v1533_v2, %v1397_v3  ;;  %v835_v8 = vld [vmem:[%s1964_s12 + $0xa8] sm:$0xff]  ;;  %v838_v11 = vld [vmem:[%s1964_s12 + $0xc0] sm:$0xff]  ;;  %v1520_v14 = vld [vmem:[%s1976_s20 + $0x34] sm:$0xf0] }
  0x2e   : > { %666 = vmatpush.bf16.msra.mxu1 %v1555_v17  ;;  %1670 = vmatpush.bf16.msra.mxu3 %v1555_v17  ;;  %v831_v10 = vld [vmem:[%s1964_s12 + $0x88] sm:$0xff]  ;;  %v1403_v15 = vld [vmem:[%s1976_s20 + $0xb0] sm:$0xf]  ;;  %v1536_v16 = vld [vmem:[%s1976_s20 + $0xb4] sm:$0xf0] }
  0x2f   : > { %883 = vperm.xlu1 %1734, %v821_v19   ;;  %878 = vperm.xlu0 %1733, %v820_v20   ;;  %v839_v12 = vld [vmem:[%s1964_s12 + $0xc8] sm:$0xff]  ;;  %v1519_v17 = vld [vmem:[%s1976_s20 + $0x34] sm:$0xf]  ;;  %v1405_v20 = vld [vmem:[%s1976_s20 + $0xb8] sm:$0xf0] }
  0x30   : > { %888 = vperm.xlu2 %1735, %v822_v43   ;;  %v1535_v19 = vld [vmem:[%s1976_s20 + $0xb4] sm:$0xf]  ;;  %v841_v25 = vld [vmem:[%s1964_s12 + $0xd8] sm:$0xff]  ;;  %v842_v26 = vld [vmem:[%s1964_s12 + $0xe0] sm:$0xff] }
  0x31   : > { %578 = vmatpush.bf16.msra.mxu0 %v1546_v18  ;;  %1663 = vmatpush.bf16.msra.mxu2 %v1546_v18  ;;  %v1341_v18 = vld [vmem:[%s1976_s20 + $0x38] sm:$0xf0]  ;;  %v1408_v24 = vor.u32 %v1535_v19, %v1405_v20  ;;  %v834_v27 = vld [vmem:[%s1964_s12 + $0xa0] sm:$0xff]  ;;  %v844_v28 = vld [vmem:[%s1964_s12 + $0xf0] sm:$0xff] }
  0x32   : > { %667 = vmatpush.bf16.msra.mxu1 %v1554_v21  ;;  %1671 = vmatpush.bf16.msra.mxu3 %v1554_v21  ;;  %v1340_v21 = vor.u32 %v1520_v14, %v1339_v13  ;;  %v845_v29 = vld [vmem:[%s1964_s12 + $0xf8] sm:$0xff]  ;;  %v1347_v30 = vld [vmem:[%s1976_s20 + $0x40] sm:$0xf]  ;;  %v1522_v31 = vld [vmem:[%s1976_s20 + $0x44] sm:$0xf0] }
  0x33   : > { %v1348_v38 = vor.u32 %v1522_v31, %v1347_v30  ;;  %v837_v42 = vld [vmem:[%s1964_s12 + $0xb8] sm:$0xff]  ;;  %v840_v43 = vld [vmem:[%s1964_s12 + $0xd0] sm:$0xff]  ;;  %v1427_v59 = vld [vmem:[%s1976_s20 + $0xe0] sm:$0xf] }
  0x34   : > { %v1355_v44 = vld [vmem:[%s1976_s20 + $0x50] sm:$0xf]  ;;  %v1524_v45 = vld [vmem:[%s1976_s20 + $0x54] sm:$0xf0]  ;;  %v1523_v48 = vld [vmem:[%s1976_s20 + $0x54] sm:$0xf] }
  0x35   : > { %579 = vmatpush.bf16.msra.mxu0 %v1545_v22  ;;  %1664 = vmatpush.bf16.msra.mxu2 %v1545_v22  ;;  %v1404_v22 = vor.u32 %v1536_v16, %v1403_v15  ;;  %v1419_v46 = vld [vmem:[%s1976_s20 + $0xd0] sm:$0xf]  ;;  %v1540_v47 = vld [vmem:[%s1976_s20 + $0xd4] sm:$0xf0]  ;;  %v1357_v49 = vld [vmem:[%s1976_s20 + $0x58] sm:$0xf0] }
  0x36   : > { %668 = vmatpush.bf16.msra.mxu1 %v1553_v23  ;;  %1672 = vmatpush.bf16.msra.mxu3 %v1553_v23  ;;  %v1344_v23 = vor.u32 %v1519_v17, %v1341_v18  ;;  %v1542_v60 = vld [vmem:[%s1976_s20 + $0xe4] sm:$0xf0]  ;;  %v1365_v62 = vld [vmem:[%s1976_s20 + $0x68] sm:$0xf0]  ;;  %v1541_v63 = vld [vmem:[%s1976_s20 + $0xe4] sm:$0xf] }
  0x37   : > { %898 = vperm.xlu1 %1734, %v824_v36   ;;  %893 = vperm.xlu0 %1733, %v823_v37   ;;  %v1537_v36 = vld [vmem:[%s1976_s20 + $0xc4] sm:$0xf]  ;;  %v1413_v37 = vld [vmem:[%s1976_s20 + $0xc8] sm:$0xf0]  ;;  %v1428_v2 = vor.u32 %v1542_v60, %v1427_v59 }
  0x38   : > { %580 = vmatmul.bf16.vlgmr.msra.gmra.mxu0 %v1316_v32  ;;  %620 = vmatmul.bf16.vlgmr.msra.gmra.mxu2 %v1380_v33  ;;  %v1411_v32 = vld [vmem:[%s1976_s20 + $0xc0] sm:$0xf]  ;;  %v1538_v33 = vld [vmem:[%s1976_s20 + $0xc4] sm:$0xf0]  ;;  %v1416_v41 = vor.u32 %v1537_v36, %v1413_v37  ;;  %v1429_v0 = vld [vmem:[%s1976_s20 + $0xe8] sm:$0xf0] }
  0x39   : > { %669 = vmatmul.bf16.vlgmr.msra.gmra.mxu1 %v1320_v34  ;;  %709 = vmatmul.bf16.vlgmr.msra.gmra.mxu3 %v1384_v35  ;;  %v1521_v34 = vld [vmem:[%s1976_s20 + $0x44] sm:$0xf]  ;;  %v1349_v35 = vld [vmem:[%s1976_s20 + $0x48] sm:$0xf0] }
  0x3a   : > { %903 = vperm.xlu2 %1735, %v825_v56   ;;  %v843_v56 = vld [vmem:[%s1964_s12 + $0xe8] sm:$0xff] }
  0x3f   : > { %913 = vperm.xlu1 %1734, %v827_v39   ;;  %908 = vperm.xlu0 %1733, %v826_v40   ;;  %v1412_v39 = vor.u32 %v1538_v33, %v1411_v32  ;;  %v1352_v40 = vor.u32 %v1521_v34, %v1349_v35 }
  0x42   : > { %918 = vperm.xlu2 %1735, %v828_v61   ;;  %v1525_v61 = vld [vmem:[%s1976_s20 + $0x64] sm:$0xf] }
  0x43   : > { %v1368_v3 = vor.u32 %v1525_v61, %v1365_v62 }
  0x47   : > { %928 = vperm.xlu1 %1734, %v830_v54   ;;  %923 = vperm.xlu0 %1733, %v829_v55   ;;  %v1360_v54 = vor.u32 %v1523_v48, %v1357_v49 }
  0x48   : > { %585 = vmatmul.bf16.gmra.mxu0 %v1324_v50  ;;  %625 = vmatmul.bf16.gmra.mxu2 %v1388_v51  ;;  %v1539_v50 = vld [vmem:[%s1976_s20 + $0xd4] sm:$0xf]  ;;  %v1421_v51 = vld [vmem:[%s1976_s20 + $0xd8] sm:$0xf0] }
  0x49   : > { %674 = vmatmul.bf16.gmra.mxu1 %v1328_v52  ;;  %714 = vmatmul.bf16.gmra.mxu3 %v1392_v53  ;;  %v1356_v52 = vor.u32 %v1524_v45, %v1355_v44  ;;  %v1420_v53 = vor.u32 %v1540_v47, %v1419_v46  ;;  %v1424_v55 = vor.u32 %v1539_v50, %v1421_v51 }
  0x4a   : > { %933 = vperm.xlu2 %1735, %v831_v10   ;;  %v1373_v10 = vld [vmem:[%s1976_s20 + $0x78] sm:$0xf0] }
  0x4f   : > { %938 = vperm.xlu0 %1733, %v832_v57   ;;  %943 = vperm.xlu1 %1734, %v833_v58   ;;  %v1363_v57 = vld [vmem:[%s1976_s20 + $0x60] sm:$0xf]  ;;  %v1526_v58 = vld [vmem:[%s1976_s20 + $0x64] sm:$0xf0] }
  0x50   : > { %v1364_v1 = vor.u32 %v1526_v58, %v1363_v57 }
  0x52   : > { %948 = vperm.xlu2 %1735, %v834_v27  }
  0x57   : > { %953 = vperm.xlu0 %1733, %v835_v8   ;;  %958 = vperm.xlu1 %1734, %v836_v9   ;;  %v1544_v8 = vld [vmem:[%s1976_s20 + $0xf4] sm:$0xf0]  ;;  %v1527_v9 = vld [vmem:[%s1976_s20 + $0x74] sm:$0xf] }
  0x58   : > { %590 = vmatmul.bf16.gmra.mxu0 %v1332_v4  ;;  %630 = vmatmul.bf16.gmra.mxu2 %v1396_v5  ;;  %v1432_v4 = vor.u32 %v1541_v63, %v1429_v0  ;;  %v1371_v5 = vld [vmem:[%s1976_s20 + $0x70] sm:$0xf]  ;;  %v1376_v15 = vor.u32 %v1527_v9, %v1373_v10 }
  0x59   : > { %679 = vmatmul.bf16.gmra.mxu1 %v1336_v6  ;;  %719 = vmatmul.bf16.gmra.mxu3 %v1400_v7  ;;  %v1528_v6 = vld [vmem:[%s1976_s20 + $0x74] sm:$0xf0]  ;;  %v1435_v7 = vld [vmem:[%s1976_s20 + $0xf0] sm:$0xf] }
  0x5a   : > { %963 = vperm.xlu2 %1735, %v837_v42   ;;  %v1372_v13 = vor.u32 %v1528_v6, %v1371_v5  ;;  %v1436_v14 = vor.u32 %v1544_v8, %v1435_v7 }
  0x5f   : > { %968 = vperm.xlu0 %1733, %v838_v11   ;;  %973 = vperm.xlu1 %1734, %v839_v12   ;;  %v1543_v11 = vld [vmem:[%s1976_s20 + $0xf4] sm:$0xf]  ;;  %v1437_v12 = vld [vmem:[%s1976_s20 + $0xf8] sm:$0xf0] }
  0x60   : > { %v1440_v16 = vor.u32 %v1543_v11, %v1437_v12 }
  0x62   : > { %978 = vperm.xlu2 %1735, %v840_v43  }
  0x67   : > { %983 = vperm.xlu0 %1733, %v841_v25   ;;  %988 = vperm.xlu1 %1734, %v842_v26  }
  0x68   : > { %595 = vmatmul.bf16.gmra.mxu0 %v1340_v21  ;;  %635 = vmatmul.bf16.gmra.mxu2 %v1404_v22 }
  0x69   : > { %684 = vmatmul.bf16.gmra.mxu1 %v1344_v23  ;;  %724 = vmatmul.bf16.gmra.mxu3 %v1408_v24 }
  0x6a   : > { %993 = vperm.xlu2 %1735, %v843_v56  }
  0x6f   : > { %998 = vperm.xlu0 %1733, %v844_v28   ;;  %1003 = vperm.xlu1 %1734, %v845_v29  }
  0x78   : > { %600 = vmatmul.bf16.gmra.mxu0 %v1348_v38  ;;  %640 = vmatmul.bf16.gmra.mxu2 %v1412_v39 }
  0x79   : > { %689 = vmatmul.bf16.gmra.mxu1 %v1352_v40  ;;  %729 = vmatmul.bf16.gmra.mxu3 %v1416_v41 }
  0x88   : > { %605 = vmatmul.bf16.gmra.mxu0 %v1356_v52  ;;  %645 = vmatmul.bf16.gmra.mxu2 %v1420_v53 }
  0x89   : > { %694 = vmatmul.bf16.gmra.mxu1 %v1360_v54  ;;  %734 = vmatmul.bf16.gmra.mxu3 %v1424_v55 }
  0x91   : > { %v849_v18 = vpop.permute.xlu0 %848  ;;  %v859_v39 = vpop.permute.xlu1 %858 }
  0x98   : > { %610 = vmatmul.bf16.gmra.mxu0 %v1364_v1  ;;  %650 = vmatmul.bf16.gmra.mxu2 %v1428_v2 }
  0x99   : > { %699 = vmatmul.bf16.gmra.mxu1 %v1368_v3  ;;  %739 = vmatmul.bf16.gmra.mxu3 %v1432_v4  ;;  %v854_v27 = vpop.permute.xlu0 %853  ;;  %v864_v52 = vpop.permute.xlu1 %863 }
  0xa8   : > { %615 = vmatmul.bf16.gmra.mxu0 %v1372_v13  ;;  %655 = vmatmul.bf16.gmra.mxu2 %v1436_v14 }
  0xa9   : > { %704 = vmatmul.bf16.gmra.mxu1 %v1376_v15  ;;  %744 = vmatmul.bf16.gmra.mxu3 %v1440_v16 }
  0xb5   : > { %v581_v17 = vpop.f32.mrf.mxu0 }
  0xb6   : > { %v670_v19 = vpop.f32.mrf.mxu1 }
  0xb7   : > { %v671_v20 = vadd.f32 %v670_v19, %v581_v17 }
  0xb9   : > { %v1006_v25 = vmul.f32 %v849_v18, %v671_v20 }
  0xbb   : > { %v621_v21 = vpop.f32.mrf.mxu2  ;;  %v1076_v30 = vmul.f32 %v1006_v25, %v671_v20 }
  0xbc   : > { %v710_v22 = vpop.f32.mrf.mxu3 }
  0xbd   : > { %v583_v23 = vpop.f32.mrf.mxu0  ;;  %v2076_v35 = vadd.f32 %v710_v22, %v621_v21  ;;  %v869_v21 = vpop.permute.xlu2 %868 }
  0xbe   : > { %v672_v24 = vpop.f32.mrf.mxu1 }
  0xbf   : > { %v673_v26 = vadd.f32 %v672_v24, %v583_v23 }
  0xc1   : > { %v1565_v28 = vpack.c.bf16 %v673_v26, %v671_v20  ;;  %v1007_v29 = vmul.f32 %v854_v27, %v673_v26 }
  0xc3   : > { %1566 = vst [vmem:[%s2073_s27] sm:$0xff] %v1565_v28   ;;  %v1038_v31 = vadd.f32 %v1007_v29, %v1006_v25  ;;  %v1077_v32 = vmul.f32 %v1007_v29, %v673_v26  ;;  %v623_v33 = vpop.f32.mrf.mxu2 }
  0xc4   : > { %v712_v34 = vpop.f32.mrf.mxu3 }
  0xc5   : > { %v1108_v36 = vadd.f32 %v1077_v32, %v1076_v30  ;;  %v2078_v37 = vadd.f32 %v712_v34, %v623_v33  ;;  %v586_v38 = vpop.f32.mrf.mxu0  ;;  %v874_v30 = vpop.permute.xlu2 %873 }
  0xc6   : > { %v675_v40 = vpop.f32.mrf.mxu1  ;;  %v879_v32 = vpop.permute.xlu0 %878 }
  0xc7   : > { %v1605_v41 = vpack.c.bf16 %v2078_v37, %v2076_v35  ;;  %v676_v42 = vadd.f32 %v675_v40, %v586_v38  ;;  %v884_v40 = vpop.permute.xlu1 %883 }
  0xc9   : > { %1649 = vst [vmem:[%s2073_s27 + $0x40] sm:$0xff] %v1605_v41   ;;  %v1008_v43 = vmul.f32 %v859_v39, %v676_v42 }
  0xcb   : > { %v1039_v44 = vadd.f32 %v1038_v31, %v1008_v43  ;;  %v1078_v45 = vmul.f32 %v1008_v43, %v676_v42  ;;  %v626_v46 = vpop.f32.mrf.mxu2 }
  0xcc   : > { %v715_v47 = vpop.f32.mrf.mxu3 }
  0xcd   : > { %v1109_v48 = vadd.f32 %v1108_v36, %v1078_v45  ;;  %v588_v49 = vpop.f32.mrf.mxu0  ;;  %v2086_v59 = vadd.f32 %v715_v47, %v626_v46 }
  0xce   : > { %v677_v50 = vpop.f32.mrf.mxu1 }
  0xcf   : > { %v678_v51 = vadd.f32 %v677_v50, %v588_v49 }
  0xd1   : > { %v1570_v53 = vpack.c.bf16 %v678_v51, %v676_v42  ;;  %v1009_v54 = vmul.f32 %v864_v52, %v678_v51 }
  0xd3   : > { %1642 = vst [vmem:[%s2073_s27 + $0x8] sm:$0xff] %v1570_v53   ;;  %v2084_v55 = vadd.f32 %v1039_v44, %v1009_v54  ;;  %v1079_v56 = vmul.f32 %v1009_v54, %v678_v51  ;;  %v628_v57 = vpop.f32.mrf.mxu2  ;;  %v889_v44 = vpop.permute.xlu2 %888 }
  0xd4   : > { %v717_v58 = vpop.f32.mrf.mxu3  ;;  %v899_v51 = vpop.permute.xlu1 %898 }
  0xd5   : > { %v2088_v60 = vadd.f32 %v1109_v48, %v1079_v56  ;;  %v2090_v61 = vadd.f32 %v717_v58, %v628_v57  ;;  %v591_v62 = vpop.f32.mrf.mxu0  ;;  %v894_v48 = vpop.permute.xlu0 %893 }
  0xd6   : > { %v680_v63 = vpop.f32.mrf.mxu1 }
  0xd7   : > { %v1610_v0 = vpack.c.bf16 %v2090_v61, %v2086_v59  ;;  %v2095_v5 = vadd.f32 %v680_v63, %v591_v62 }
  0xd9   : > { %1650 = vst [vmem:[%s2073_s27 + $0x48] sm:$0xff] %v1610_v0  }
  0xdb   : > { %v631_v1 = vpop.f32.mrf.mxu2  ;;  %v904_v57 = vpop.permute.xlu2 %903 }
  0xdc   : > { %v720_v2 = vpop.f32.mrf.mxu3 }
  0xdd   : > { %v593_v3 = vpop.f32.mrf.mxu0  ;;  %v2102_v10 = vadd.f32 %v720_v2, %v631_v1  ;;  %v909_v63 = vpop.permute.xlu0 %908 }
  0xde   : > { %v682_v4 = vpop.f32.mrf.mxu1  ;;  %v914_v2 = vpop.permute.xlu1 %913 }
  0xdf   : > { %v2097_v6 = vadd.f32 %v682_v4, %v593_v3 }
  0xe1   : > { %v1575_v7 = vpack.c.bf16 %v2097_v6, %v2095_v5 }
  0xe3   : > { %1643 = vst [vmem:[%s2073_s27 + $0x10] sm:$0xff] %v1575_v7   ;;  %v633_v8 = vpop.f32.mrf.mxu2 }
  0xe4   : > { %v722_v9 = vpop.f32.mrf.mxu3 }
  0xe5   : > { %v2104_v11 = vadd.f32 %v722_v9, %v633_v8  ;;  %v596_v12 = vpop.f32.mrf.mxu0  ;;  %v1010_v9 = vmul.f32 %v869_v21, %v2095_v5 }
  0xe6   : > { %v685_v13 = vpop.f32.mrf.mxu1 }
  0xe7   : > { %v1615_v14 = vpack.c.bf16 %v2104_v11, %v2102_v10  ;;  %v2109_v19 = vadd.f32 %v685_v13, %v596_v12 }
  0xe9   : > { %1651 = vst [vmem:[%s2073_s27 + $0x50] sm:$0xff] %v1615_v14   ;;  %v1011_v14 = vmul.f32 %v874_v30, %v2097_v6 }
  0xeb   : > { %v636_v15 = vpop.f32.mrf.mxu2 }
  0xec   : > { %v725_v16 = vpop.f32.mrf.mxu3 }
  0xed   : > { %v598_v17 = vpop.f32.mrf.mxu0  ;;  %v2116_v25 = vadd.f32 %v725_v16, %v636_v15  ;;  %v919_v15 = vpop.permute.xlu2 %918 }
  0xee   : > { %v687_v18 = vpop.f32.mrf.mxu1  ;;  %v2147_v16 = vpop.permute.xlu0 %923 }
  0xef   : > { %v2111_v20 = vadd.f32 %v687_v18, %v598_v17  ;;  %v1080_v17 = vmul.f32 %v1010_v9, %v2095_v5  ;;  %v1012_v18 = vmul.f32 %v879_v32, %v2109_v19 }
  0xf1   : > { %v1580_v22 = vpack.c.bf16 %v2111_v20, %v2109_v19  ;;  %v1013_v21 = vmul.f32 %v884_v40, %v2111_v20  ;;  %v1111_v30 = vadd.f32 %v2088_v60, %v1080_v17 }
  0xf3   : > { %1644 = vst [vmem:[%s2073_s27 + $0x18] sm:$0xff] %v1580_v22   ;;  %v638_v23 = vpop.f32.mrf.mxu2 }
  0xf4   : > { %v727_v24 = vpop.f32.mrf.mxu3 }
  0xf5   : > { %v2118_v26 = vadd.f32 %v727_v24, %v638_v23  ;;  %v601_v27 = vpop.f32.mrf.mxu0  ;;  %v1041_v23 = vadd.f32 %v2084_v55, %v1010_v9  ;;  %v1081_v24 = vmul.f32 %v1011_v14, %v2097_v6  ;;  %v1083_v55 = vmul.f32 %v1013_v21, %v2111_v20 }
  0xf6   : > { %v690_v28 = vpop.f32.mrf.mxu1 }
  0xf7   : > { %v1620_v29 = vpack.c.bf16 %v2118_v26, %v2116_v25  ;;  %v691_v38 = vadd.f32 %v690_v28, %v601_v27 }
  0xf9   : > { %1652 = vst [vmem:[%s2073_s27 + $0x58] sm:$0xff] %v1620_v29   ;;  %v929_v29 = vpop.permute.xlu1 %928 }
  0xfb   : > { %v641_v31 = vpop.f32.mrf.mxu2 }
  0xfc   : > { %v730_v33 = vpop.f32.mrf.mxu3 }
  0xfd   : > { %v603_v34 = vpop.f32.mrf.mxu0  ;;  %v2127_v45 = vadd.f32 %v730_v33, %v641_v31  ;;  %v1042_v31 = vadd.f32 %v1041_v23, %v1011_v14  ;;  %v1082_v33 = vmul.f32 %v1012_v18, %v2109_v19 }
  0xfe   : > { %v692_v36 = vpop.f32.mrf.mxu1 }
  0xff   : > { %v2123_v39 = vadd.f32 %v692_v36, %v603_v34  ;;  %v1014_v34 = vmul.f32 %v889_v44, %v691_v38 }
 0x101   : > { %v1585_v41 = vpack.c.bf16 %v2123_v39, %v691_v38  ;;  %v1015_v6 = vmul.f32 %v894_v48, %v2123_v39 }
 0x103   : > { %1645 = vst [vmem:[%s2073_s27 + $0x20] sm:$0xff] %v1585_v41   ;;  %v643_v42 = vpop.f32.mrf.mxu2  ;;  %v1112_v41 = vadd.f32 %v1111_v30, %v1081_v24 }
 0x104   : > { %v732_v43 = vpop.f32.mrf.mxu3 }
 0x105   : > { %v2129_v46 = vadd.f32 %v732_v43, %v643_v42  ;;  %v606_v47 = vpop.f32.mrf.mxu0  ;;  %v1043_v42 = vadd.f32 %v1042_v31, %v1012_v18  ;;  %v1113_v43 = vadd.f32 %v1112_v41, %v1082_v33 }
 0x106   : > { %v695_v49 = vpop.f32.mrf.mxu1 }
 0x107   : > { %v1625_v50 = vpack.c.bf16 %v2129_v46, %v2127_v45  ;;  %v696_v58 = vadd.f32 %v695_v49, %v606_v47  ;;  %v1044_v47 = vadd.f32 %v1043_v42, %v1013_v21  ;;  %v1084_v49 = vmul.f32 %v1014_v34, %v691_v38 }
 0x108   : > { %v1114_v19 = vadd.f32 %v1113_v43, %v1083_v55  ;;  %v1022_v55 = vmul.f32 %v929_v29, %v2076_v35 }
 0x109   : > { %1653 = vst [vmem:[%s2073_s27 + $0x60] sm:$0xff] %v1625_v50   ;;  %v934_v50 = vpop.permute.xlu2 %933  ;;  %v1016_v60 = vmul.f32 %v899_v51, %v696_v58  ;;  %v1045_v44 = vadd.f32 %v1044_v47, %v1014_v34 }
 0x10a   : > { %v1115_v38 = vadd.f32 %v1114_v19, %v1084_v49  ;;  %v1092_v29 = vmul.f32 %v1022_v55, %v2076_v35 }
 0x10b   : > { %v646_v52 = vpop.f32.mrf.mxu2  ;;  %v1086_v9 = vmul.f32 %v1016_v60, %v696_v58 }
 0x10c   : > { %v735_v53 = vpop.f32.mrf.mxu3 }
 0x10d   : > { %v608_v54 = vpop.f32.mrf.mxu0  ;;  %v2138_v4 = vadd.f32 %v735_v53, %v646_v52  ;;  %v939_v53 = vpop.permute.xlu0 %938 }
 0x10e   : > { %v697_v56 = vpop.f32.mrf.mxu1  ;;  %v1024_v19 = vmul.f32 %v939_v53, %v2086_v59 }
 0x10f   : > { %v2134_v62 = vadd.f32 %v697_v56, %v608_v54  ;;  %v1085_v56 = vmul.f32 %v1015_v6, %v2123_v39 }
 0x111   : > { %v1590_v0 = vpack.c.bf16 %v2134_v62, %v696_v58  ;;  %v1116_v17 = vadd.f32 %v1115_v38, %v1085_v56 }
 0x113   : > { %1646 = vst [vmem:[%s2073_s27 + $0x28] sm:$0xff] %v1590_v0   ;;  %v648_v1 = vpop.f32.mrf.mxu2  ;;  %v1017_v0 = vmul.f32 %v904_v57, %v2134_v62 }
 0x114   : > { %v737_v3 = vpop.f32.mrf.mxu3 }
 0x115   : > { %v2140_v7 = vadd.f32 %v737_v3, %v648_v1  ;;  %v611_v8 = vpop.f32.mrf.mxu0  ;;  %v944_v3 = vpop.permute.xlu1 %943  ;;  %v1087_v57 = vmul.f32 %v1017_v0, %v2134_v62 }
 0x116   : > { %v700_v12 = vpop.f32.mrf.mxu1  ;;  %v954_v34 = vpop.permute.xlu0 %953  ;;  %v1025_v38 = vmul.f32 %v944_v3, %v2090_v61 }
 0x117   : > { %v1630_v13 = vpack.c.bf16 %v2140_v7, %v2138_v4  ;;  %v701_v36 = vadd.f32 %v700_v12, %v611_v8  ;;  %v1046_v8 = vadd.f32 %v1045_v44, %v1015_v6 }
 0x119   : > { %1654 = vst [vmem:[%s2073_s27 + $0x68] sm:$0xff] %v1630_v13   ;;  %v1018_v12 = vmul.f32 %v909_v63, %v701_v36  ;;  %v1047_v39 = vadd.f32 %v1046_v8, %v1016_v60 }
 0x11b   : > { %v651_v22 = vpop.f32.mrf.mxu2  ;;  %v1048_v23 = vadd.f32 %v1047_v39, %v1017_v0  ;;  %v1088_v24 = vmul.f32 %v1018_v12, %v701_v36 }
 0x11c   : > { %v740_v27 = vpop.f32.mrf.mxu3 }
 0x11d   : > { %v613_v28 = vpop.f32.mrf.mxu0  ;;  %v2161_v20 = vadd.f32 %v740_v27, %v651_v22  ;;  %v1117_v22 = vadd.f32 %v1116_v17, %v1086_v9  ;;  %v1049_v63 = vadd.f32 %v1048_v23, %v1018_v12  ;;  %v1094_v9 = vmul.f32 %v1024_v19, %v2086_v59 }
 0x11e   : > { %v702_v5 = vpop.f32.mrf.mxu1 }
 0x11f   : > { %v703_v32 = vadd.f32 %v702_v5, %v613_v28  ;;  %v949_v28 = vpop.permute.xlu2 %948  ;;  %v1118_v58 = vadd.f32 %v1117_v22, %v1087_v57 }
 0x120   : > { %v1026_v12 = vmul.f32 %v949_v28, %v2102_v10 }
 0x121   : > { %v1595_v40 = vpack.c.bf16 %v703_v32, %v701_v36  ;;  %v1019_v18 = vmul.f32 %v914_v2, %v703_v32  ;;  %v1119_v41 = vadd.f32 %v1118_v58, %v1088_v24  ;;  %v959_v36 = vpop.permute.xlu1 %958 }
 0x123   : > { %1647 = vst [vmem:[%s2073_s27 + $0x30] sm:$0xff] %v1595_v40   ;;  %v653_v52 = vpop.f32.mrf.mxu2  ;;  %v1089_v31 = vmul.f32 %v1019_v18, %v703_v32  ;;  %v1050_v62 = vadd.f32 %v1049_v63, %v1019_v18  ;;  %v1023_v32 = vmul.f32 %v934_v50, %v2078_v37 }
 0x124   : > { %v742_v54 = vpop.f32.mrf.mxu3 }
 0x125   : > { %v2163_v48 = vadd.f32 %v742_v54, %v653_v52  ;;  %v616_v1 = vpop.f32.mrf.mxu0  ;;  %v1093_v50 = vmul.f32 %v1023_v32, %v2078_v37 }
 0x126   : > { %v705_v51 = vpop.f32.mrf.mxu1 }
 0x127   : > { %v1635_v13 = vpack.c.bf16 %v2163_v48, %v2161_v20  ;;  %v706_v14 = vadd.f32 %v705_v51, %v616_v1  ;;  %v964_v1 = vpop.permute.xlu2 %963  ;;  %v969_v51 = vpop.permute.xlu0 %968 }
 0x129   : > { %1655 = vst [vmem:[%s2073_s27 + $0x70] sm:$0xff] %v1635_v13   ;;  %v1020_v21 = vmul.f32 %v919_v15, %v706_v14  ;;  %v1120_v15 = vadd.f32 %v1119_v41, %v1089_v31  ;;  %v974_v37 = vpop.permute.xlu1 %973 }
 0x12b   : > { %v656_v27 = vpop.f32.mrf.mxu2  ;;  %v1090_v2 = vmul.f32 %v1020_v21, %v706_v14  ;;  %v1051_v6 = vadd.f32 %v1050_v62, %v1020_v21 }
 0x12c   : > { %v745_v30 = vpop.f32.mrf.mxu3 }
 0x12d   : > { %v618_v33 = vpop.f32.mrf.mxu0  ;;  %v1121_v47 = vadd.f32 %v1120_v15, %v1090_v2  ;;  %v2180_v54 = vadd.f32 %v745_v30, %v656_v27 }
 0x12e   : > { %v707_v5 = vpop.f32.mrf.mxu1 }
 0x12f   : > { %v708_v42 = vadd.f32 %v707_v5, %v618_v33 }
 0x131   : > { %v1600_v40 = vpack.c.bf16 %v708_v42, %v706_v14  ;;  %v1021_v43 = vmul.f32 %v2147_v16, %v708_v42 }
 0x133   : > { %1648 = vst [vmem:[%s2073_s27 + $0x38] sm:$0xff] %v1600_v40   ;;  %v1052_v49 = vadd.f32 %v1051_v6, %v1021_v43  ;;  %v1091_v60 = vmul.f32 %v1021_v43, %v708_v42  ;;  %v658_v52 = vpop.f32.mrf.mxu2 }
 0x134   : > { %v747_v44 = vpop.f32.mrf.mxu3 }
 0x135   : > { %v1053_v16 = vadd.f32 %v1052_v49, %v1022_v55  ;;  %v1122_v56 = vadd.f32 %v1121_v47, %v1091_v60  ;;  %v2182_v0 = vadd.f32 %v747_v44, %v658_v52 }
 0x137   : > { %v1054_v35 = vadd.f32 %v1053_v16, %v1023_v32  ;;  %v1123_v53 = vadd.f32 %v1122_v56, %v1092_v29  ;;  %v1640_v8 = vpack.c.bf16 %v2182_v0, %v2180_v54 }
 0x139   : > { %v1055_v13 = vadd.f32 %v1054_v35, %v1024_v19  ;;  %v1124_v14 = vadd.f32 %v1123_v53, %v1093_v50  ;;  %1656 = vst [vmem:[%s2073_s27 + $0x78] sm:$0xff] %v1640_v8  }
 0x13a   : > { %1793 = shalt.err (!%p1790_p8)
}
 0x13b   : > { %s1870_s23 = smov 64   ;;  %s1871_s27 = smov 4   ;;  %v1095_v59 = vmul.f32 %v1025_v38, %v2090_v61  ;;  %v1027_v3 = vmul.f32 %v954_v34, %v2104_v11  ;;  %v1056_v17 = vadd.f32 %v1055_v13, %v1025_v38  ;;  %v1125_v39 = vadd.f32 %v1124_v14, %v1094_v9  ;;  %v979_v30 = vpop.permute.xlu2 %978  ;;  %v984_v33 = vpop.permute.xlu0 %983 }
 0x13c   : > { %1677 = dma.vmem_to_hbm [thread:$0]  (%p1935_p5), %s2185_s6, 2048, %s1167_s7, %s1147_s8, %s1870_s23, %s1870_s23, %s1871_s27   ;;  %v1096_v57 = vmul.f32 %v1026_v12, %v2102_v10  ;;  %v1028_v18 = vmul.f32 %v959_v36, %v2116_v25  ;;  %v1029_v21 = vmul.f32 %v964_v1, %v2118_v26  ;;  %v1030_v61 = vmul.f32 %v969_v51, %v2127_v45  ;;  %v989_v62 = vpop.permute.xlu1 %988 }
 0x13d   : > { %v1057_v22 = vadd.f32 %v1056_v17, %v1026_v12  ;;  %v1126_v23 = vadd.f32 %v1125_v39, %v1095_v59  ;;  %v1097_v24 = vmul.f32 %v1027_v3, %v2104_v11  ;;  %v1031_v34 = vmul.f32 %v974_v37, %v2129_v46  ;;  %s1307_s28 = sshll.u32 %s2070_s22, 3  ;;  %s1509_s29 = sshll.u32 %s1918_s19, 3 }
 0x13e   : > { %v1098_v58 = vmul.f32 %v1028_v18, %v2116_v25  ;;  %v1099_v10 = vmul.f32 %v1029_v21, %v2118_v26  ;;  %v1100_v11 = vmul.f32 %v1030_v61, %v2127_v45  ;;  %v1032_v2 = vmul.f32 %v979_v30, %v2138_v4  ;;  %s1179_s6 = scalar_lea.hbm %s2266_s4, %s1509_s29  ;;  %s237_s7 = scalar_lea.vmem [#allocation6], %s1307_s28 }
 0x13f   : > { %v1058_v27 = vadd.f32 %v1057_v22, %v1027_v3  ;;  %v1127_v28 = vadd.f32 %v1126_v23, %v1096_v57  ;;  %v1101_v25 = vmul.f32 %v1031_v34, %v2129_v46  ;;  %v1033_v36 = vmul.f32 %v984_v33, %v2140_v7  ;;  %s1181_s8 = sshll.u32 %s237_s7, 4  ;;  %s1183_s9 = sshll.u32 %s1179_s6, 4  ;;  %s1182_s8 = int_to_ptr.vmem [resolvable:$true] %s1181_s8  ;;  %s1184_s9 = int_to_ptr.hbm [resolvable:$true] %s1183_s9 }
 0x140   : > { %v1102_v40 = vmul.f32 %v1032_v2, %v2138_v4  ;;  %v1034_v26 = vmul.f32 %v989_v62, %v2161_v20  ;;  %s1152_s19 = scalar_lea.sflag [#allocation7], %s2070_s22  ;;  %s1808_s10 = sshra.s32 %s1184_s9, 4  ;;  %s1809_s10 = int_to_ptr.hbm [resolvable:$true] %s1808_s10 }
 0x141   : > { %v1059_v63 = vadd.f32 %v1058_v27, %v1028_v18  ;;  %v1128_v31 = vadd.f32 %v1127_v28, %v1097_v24  ;;  %v1103_v49 = vmul.f32 %v1033_v36, %v2140_v7  ;;  %s1810_s11 = scalar_lea.hbm %s1809_s10, 8  ;;  %s1814_s14 = scalar_lea.hbm %s2266_s4, 16 }
 0x142   : > { %v1104_v46 = vmul.f32 %v1034_v26, %v2161_v20  ;;  %p1811_p9 = scmp.ne.s32.totalorder %s1809_s10, %s1810_s11  ;;  %p1815_p12 = scmp.lt.s32.totalorder %s1809_s10, %s2266_s4 }
 0x143   : > { %v1129_v5 = vadd.f32 %v1128_v31, %v1098_v58  ;;  %v1060_v41 = vadd.f32 %v1059_v63, %v1029_v21  ;;  %v994_v47 = vpop.permute.xlu2 %993  ;;  %v999_v29 = vpop.permute.xlu0 %998  ;;  %p1816_p13 = scmp.lt.s32.totalorder %s1814_s14, %s1810_s11 }
 0x144   : > { %v1035_v45 = vmul.f32 %v994_v47, %v2163_v48  ;;  %v1036_v19 = vmul.f32 %v999_v29, %v2180_v54  ;;  %v1004_v4 = vpop.permute.xlu1 %1003  ;;  %p1812_p10 = pnand %p1811_p9, %p1935_p5 }
 0x145   : > { %v1061_v42 = vadd.f32 %v1060_v41, %v1030_v61  ;;  %v1130_v55 = vadd.f32 %v1129_v5, %v1099_v10  ;;  %v1037_v50 = vmul.f32 %v1004_v4, %v2182_v0  ;;  %p1817_p0 = por %p1816_p13, %p1815_p12 }
 0x146   : > { %v1105_v56 = vmul.f32 %v1035_v45, %v2163_v48  ;;  %v1106_v38 = vmul.f32 %v1036_v19, %v2180_v54  ;;  %p1813_p11 = pneg %p1812_p10 }
 0x147   : > { %v1062_v15 = vadd.f32 %v1061_v42, %v1031_v34  ;;  %v1131_v6 = vadd.f32 %v1130_v55, %v1100_v11  ;;  %v1107_v20 = vmul.f32 %v1037_v50, %v2182_v0 }
 0x148   : > { %p1818_p1 = pnand %p1817_p0, %p1813_p11 }
 0x149   : > { %v1063_v43 = vadd.f32 %v1062_v15, %v1032_v2  ;;  %v1132_v32 = vadd.f32 %v1131_v6, %v1101_v25 }
 0x14b   : > { %v1064_v60 = vadd.f32 %v1063_v43, %v1033_v36  ;;  %v1133_v52 = vadd.f32 %v1132_v32, %v1102_v40 }
 0x14d   : > { %v1065_v44 = vadd.f32 %v1064_v60, %v1034_v26  ;;  %v1134_v16 = vadd.f32 %v1133_v52, %v1103_v49 }
 0x14f   : > { %v1066_v1 = vadd.f32 %v1065_v44, %v1035_v45  ;;  %v1135_v7 = vadd.f32 %v1134_v16, %v1104_v46 }
 0x151   : > { %v1067_v35 = vadd.f32 %v1066_v1, %v1036_v19  ;;  %v1136_v53 = vadd.f32 %v1135_v7, %v1105_v56 }
 0x153   : > { %v1068_v8 = vadd.f32 %v1067_v35, %v1037_v50  ;;  %v1137_v51 = vadd.f32 %v1136_v53, %v1106_v38 }
 0x155   : > { %v1069_v9 = vrot.slane %v1068_v8, 4  ;;  %v1138_v12 = vadd.f32 %v1137_v51, %v1107_v20 }
 0x157   : > { %v1070_v13 = vadd.f32 %v1069_v9, %v1068_v8  ;;  %v1139_v14 = vrot.slane %v1138_v12, 4 }
 0x159   : > { %v1071_v37 = vrot.slane %v1070_v13, 2  ;;  %v1140_v48 = vadd.f32 %v1139_v14, %v1138_v12 }
 0x15b   : > { %v1072_v59 = vadd.f32 %v1071_v37, %v1070_v13  ;;  %v1141_v3 = vrot.slane %v1140_v48, 2 }
 0x15d   : > { %v1073_v54 = vrot.slane %v1072_v59, 1  ;;  %v1142_v17 = vadd.f32 %v1141_v3, %v1140_v48 }
 0x15f   : > { %v1143_v0 = vrot.slane %v1142_v17, 1  ;;  %v1074_v39 = vadd.f32 %v1073_v54, %v1072_v59 }
 0x161   : > { %1075 = vst [vmem:[%s237_s7] sm:$0x1] %v1074_v39  ;;  %v1144_v57 = vadd.f32 %v1143_v0, %v1142_v17 }
 0x163   : > { %1145 = vst [vmem:[%s237_s7 + $0x1] sm:$0x1] %v1144_v57 }
 0x164   : > { %1821 = shalt.err (!%p1818_p1)
}
 0x165   : > { %1678 = dma.vmem_to_hbm [thread:$0]  (%p1935_p5), %s1182_s8, 128, %s1184_s9, %s1152_s19  }
 0x166 PF: > { %p1694_p2 = scmp.ge.s32.totalorder %s1864_s18, 2  ;;  %s1195_s22 = sand.u32 1, %s1852_s15  }
 0x167   : > { %s1196_s27 = scalar_lea.sflag [#allocation4], %s1195_s22 }
 0x168   : > { %p1686_p3 = pnand %p1694_p2, %p1939_p6 }
 0x16a   : > { %p1687_p4 = pneg %p1686_p3 }
 0x16c   : > { %1843 = dma.done.wait (%p1687_p4), %s1196_s27, 2048  }
 0x16d   : > { %1845 = vsyncadd (%p1687_p4), %s1196_s27, 4294965248  ;;  %s1206_s28 = scalar_lea.sflag [#allocation7], %s1195_s22 }
 0x16e   : > { %1847 = dma.done.wait (%p1687_p4), %s1206_s28, 128  }
 0x16f   : > { %1849 = vsyncadd (%p1687_p4), %s1206_s28, 4294967168  ;;  %p19_p5 = scmp.ge.s32.totalorder %s1922_s21, 4   ;;  %s2269_s15 = smov %s1856_s16 }
 0x170   : > { %s2270_s16 = smov %s1860_s17  ;;  %s2271_s17 = smov %s1933_s24 }
 0x171   : > { %s2272_s18 = smov %s1922_s21  ;;  %21 = sbr.rel (!%p19_p5) target bundleno = 6 (0x6), region = 92 }
 0x176   :  { %1212 = vsyncpa [#allocation3], 1 }
 0x177   :  { %1214 = vsyncpa [#allocation3 + $0x1], 1 }
 0x178   :  { %1215 = vsyncpa [#allocation4], 1 }
 0x179   :  { %1217 = vsyncpa [#allocation4 + $0x1], 1 }
 0x17a   :  { %1218 = vsyncpa [#allocation7], 1 }
 0x17b   :  { %1220 = vsyncpa [#allocation7 + $0x1], 1 }

</bundles_post_ra>
